<compile_context>
chip_gen: v7x
topology: tpu7x:2x2x1
jax: 0.10.0
libtpu: 0.0.40
codegen_flags: <defaults>
</compile_context>

<pallas_src>
import functools

import jax
import jax.numpy as jnp
from jax.experimental import pallas as pl
from jax.experimental.pallas import tpu as pltpu

HIDDEN = 256
LANE = 128  # pad the action dim up to one full lane tile -> unmasked stores


def _fused_dqn_kernel(x_ref, w1_ref, b1_ref, w2_ref, b2_ref, w3_ref, b3_ref, o_ref):
    # One grid step == one network (0: Q_w, 1: Q_target). Whole 3-layer MLP is
    # fused: 3 MXU matmuls (bf16 weights, f32 accumulation) + 2 ReLUs.
    x = x_ref[...].astype(jnp.bfloat16)                                  # (B, S)
    h1 = jnp.dot(x, w1_ref[...], preferred_element_type=jnp.float32) + b1_ref[...]
    h1 = jnp.maximum(h1, 0.0)
    h2 = jnp.dot(h1.astype(jnp.bfloat16), w2_ref[...],
                 preferred_element_type=jnp.float32) + b2_ref[...]
    h2 = jnp.maximum(h2, 0.0)
    o_ref[...] = (jnp.dot(h2.astype(jnp.bfloat16), w3_ref[...],
                          preferred_element_type=jnp.float32) + b3_ref[...])


def _fused_forward(state, stacked_params, action_size):
    """Single pallas_call computing both Q_w and Q_target forward passes."""
    w1s, b1s, w2s, b2s, w3s, b3s = stacked_params  # each has leading dim 2
    B, S = state.shape
    H = w1s.shape[-1]

    # Pad the final layer out to a full 128-lane tile (lane-dense output store).
    pad_n = LANE - w3s.shape[-1]
    w3p = jnp.pad(w3s, ((0, 0), (0, 0), (0, pad_n)))
    b3p = jnp.pad(b3s, ((0, 0), (0, 0), (0, pad_n)))

    # Advisory cost so XLA overlaps neighbours instead of serializing blindly.
    flops = 2 * 2 * B * (S * H + H * H + H * LANE)
    bytes_w = 2 * ((S * H + H * H + H * LANE) * 2 + (H + H + LANE) * 4)
    bytes_accessed = B * S * 4 + 2 * B * LANE * 4 + bytes_w
    cost = pl.CostEstimate(flops=flops, transcendentals=0,
                           bytes_accessed=bytes_accessed)

    # Per-network parameter blocks selected by the grid index; state is shared.
    per_net = lambda shp: pl.BlockSpec((None,) + shp[1:], lambda n: (n, 0, 0))

    out = pl.pallas_call(
        _fused_dqn_kernel,
        out_shape=jax.ShapeDtypeStruct((2, B, LANE), jnp.float32),
        grid=(2,),
        in_specs=[
            pl.BlockSpec((B, S), lambda n: (0, 0)),   # state (same for both nets)
            per_net(w1s.shape), per_net(b1s.shape),
            per_net(w2s.shape), per_net(b2s.shape),
            per_net(w3p.shape), per_net(b3p.shape),
        ],
        out_specs=pl.BlockSpec((None, B, LANE), lambda n: (n, 0, 0)),
        compiler_params=pltpu.CompilerParams(
            dimension_semantics=("parallel",),        # one net per TC on v7x
        ),
        cost_estimate=cost,
    )(state, w1s, b1s, w2s, b2s, w3p, b3p)

    return out[0, :, :action_size], out[1, :, :action_size]


@functools.partial(jax.jit, static_argnames=("action_size",))
def deep_q_network_forward(state, q_w_params, q_target_params, *, action_size):
    """Equivalent of DeepQNetwork.forward: returns (Q_w(state), Q_target(state))."""
    stacked = jax.tree_util.tree_map(
        lambda a, b: jnp.stack([a, b], axis=0), q_w_params, q_target_params)
    return _fused_forward(state, stacked, action_size)


def init_q_net_params(key, state_size, action_size, hidden=HIDDEN):
    """Deterministic init mimicking torch.nn.Linear default (uniform +/- 1/sqrt(fan_in)).
    Weights stored as (in_features, out_features) in bf16; biases as (1, out) f32."""
    ks = jax.random.split(key, 6)

    def lin(kw, kb, fan_in, fan_out):
        bound = 1.0 / jnp.sqrt(jnp.float32(fan_in))
        w = jax.random.uniform(kw, (fan_in, fan_out), jnp.float32, -bound, bound)
        b = jax.random.uniform(kb, (1, fan_out), jnp.float32, -bound, bound)
        return w.astype(jnp.bfloat16), b

    w1, b1 = lin(ks[0], ks[1], state_size, hidden)
    w2, b2 = lin(ks[2], ks[3], hidden, hidden)
    w3, b3 = lin(ks[4], ks[5], hidden, action_size)
    return (w1, b1, w2, b2, w3, b3)


def _reference_mlp(state, params):
    """Plain-JAX reference mirroring the kernel's precision (bf16 matmuls, f32 acc)."""
    w1, b1, w2, b2, w3, b3 = params

    def lin(x, w, b):
        return jnp.dot(x.astype(jnp.bfloat16), w,
                       preferred_element_type=jnp.float32) + b

    h1 = jnp.maximum(lin(state, w1, b1), 0.0)
    h2 = jnp.maximum(lin(h1, w2, b2), 0.0)
    return lin(h2, w3, b3)


if __name__ == "__main__":
    state_size = 8
    action_size = 4
    batch = 8

    key = jax.random.PRNGKey(0)
    k_state, k_params = jax.random.split(key)

    state = jax.random.normal(k_state, (batch, state_size), jnp.float32)

    # Q_target.load_state_dict(Q_w.state_dict()) -> identical parameter copies here.
    q_w_params = init_q_net_params(k_params, state_size, action_size)
    q_target_params = tuple(jnp.array(p) for p in q_w_params)

    q_out, target_out = deep_q_network_forward(
        state, q_w_params, q_target_params, action_size=action_size)
    q_out = jax.block_until_ready(q_out)
    target_out = jax.block_until_ready(target_out)

    # Sanity check against a plain-JAX reference at matching precision.
    ref = _reference_mlp(state, q_w_params)
    assert q_out.shape == (batch, action_size)
    assert target_out.shape == (batch, action_size)
    assert jnp.allclose(q_out, ref, atol=1e-2, rtol=1e-2)
    assert jnp.allclose(target_out, ref, atol=1e-2, rtol=1e-2)

    print("KERNEL_OK")
</pallas_src>

<mosaic_0001>
module attributes {stable_mosaic.version = 11 : i64} {
  func.func @_fused_dqn_kernel(%arg0: i32, %arg1: memref<8x8xf32, #tpu.memory_space<vmem>>, %arg2: memref<1x8x256xbf16, #tpu.memory_space<vmem>>, %arg3: memref<1x1x256xf32, #tpu.memory_space<vmem>>, %arg4: memref<1x256x256xbf16, #tpu.memory_space<vmem>>, %arg5: memref<1x1x256xf32, #tpu.memory_space<vmem>>, %arg6: memref<1x256x128xbf16, #tpu.memory_space<vmem>>, %arg7: memref<1x1x128xf32, #tpu.memory_space<vmem>>, %arg8: memref<1x8x128xf32, #tpu.memory_space<vmem>>) attributes {dimension_semantics = [#tpu.dimension_semantics<parallel>], iteration_bounds = array<i64: 2>, scalar_prefetch = 0 : i64, scratch_operands = 0 : i64, tpu.core_type = #tpu.core_type<tc>, window_params = [{pipeline_mode = #tpu.pipeline_mode<synchronous>, transform_indices = @transform_0, window_bounds = array<i64: 8, 8>}, {transform_indices = @transform_1, window_bounds = array<i64: 1, 8, 256>}, {transform_indices = @transform_2, window_bounds = array<i64: 1, 1, 256>}, {transform_indices = @transform_3, window_bounds = array<i64: 1, 256, 256>}, {transform_indices = @transform_4, window_bounds = array<i64: 1, 1, 256>}, {transform_indices = @transform_5, window_bounds = array<i64: 1, 256, 128>}, {transform_indices = @transform_6, window_bounds = array<i64: 1, 1, 128>}, {transform_indices = @transform_7, window_bounds = array<i64: 1, 8, 128>}]} {
    %c0 = arith.constant 0 : index
    %c0_0 = arith.constant 0 : index
    %0 = vector.load %arg1[%c0, %c0_0] : memref<8x8xf32, #tpu.memory_space<vmem>>, vector<8x8xf32>
    %1 = arith.truncf %0 : vector<8x8xf32> to vector<8x8xbf16>
    %c0_1 = arith.constant 0 : index
    %c0_2 = arith.constant 0 : index
    %c0_3 = arith.constant 0 : index
    %2 = vector.load %arg2[%c0_1, %c0_2, %c0_3] : memref<1x8x256xbf16, #tpu.memory_space<vmem>>, vector<1x8x256xbf16>
    %3 = vector.shape_cast %2 : vector<1x8x256xbf16> to vector<8x256xbf16>
    %cst = arith.constant dense<0.000000e+00> : vector<8x256xf32>
    %4 = tpu.matmul %1, %3, %cst {dimension_numbers = #tpu.dot_dimension_numbers<[1], [0], [0], [1], [0, 0, 1, 1], [], []>} : vector<8x8xbf16>, vector<8x256xbf16>, vector<8x256xf32> -> vector<8x256xf32>
    %c0_4 = arith.constant 0 : index
    %c0_5 = arith.constant 0 : index
    %c0_6 = arith.constant 0 : index
    %5 = vector.load %arg3[%c0_4, %c0_5, %c0_6] : memref<1x1x256xf32, #tpu.memory_space<vmem>>, vector<1x1x256xf32>
    %6 = vector.shape_cast %5 : vector<1x1x256xf32> to vector<1x256xf32>
    %7 = vector.broadcast %6 : vector<1x256xf32> to vector<8x256xf32>
    %8 = arith.addf %4, %7 : vector<8x256xf32>
    %cst_7 = arith.constant 0.000000e+00 : f32
    %9 = vector.broadcast %cst_7 : f32 to vector<8x256xf32>
    %10 = arith.maximumf %8, %9 : vector<8x256xf32>
    %11 = arith.truncf %10 : vector<8x256xf32> to vector<8x256xbf16>
    %c0_8 = arith.constant 0 : index
    %c0_9 = arith.constant 0 : index
    %c0_10 = arith.constant 0 : index
    %12 = vector.load %arg4[%c0_8, %c0_9, %c0_10] : memref<1x256x256xbf16, #tpu.memory_space<vmem>>, vector<1x256x256xbf16>
    %13 = vector.shape_cast %12 : vector<1x256x256xbf16> to vector<256x256xbf16>
    %cst_11 = arith.constant dense<0.000000e+00> : vector<8x256xf32>
    %14 = tpu.matmul %11, %13, %cst_11 {dimension_numbers = #tpu.dot_dimension_numbers<[1], [0], [0], [1], [0, 0, 1, 1], [], []>} : vector<8x256xbf16>, vector<256x256xbf16>, vector<8x256xf32> -> vector<8x256xf32>
    %c0_12 = arith.constant 0 : index
    %c0_13 = arith.constant 0 : index
    %c0_14 = arith.constant 0 : index
    %15 = vector.load %arg5[%c0_12, %c0_13, %c0_14] : memref<1x1x256xf32, #tpu.memory_space<vmem>>, vector<1x1x256xf32>
    %16 = vector.shape_cast %15 : vector<1x1x256xf32> to vector<1x256xf32>
    %17 = vector.broadcast %16 : vector<1x256xf32> to vector<8x256xf32>
    %18 = arith.addf %14, %17 : vector<8x256xf32>
    %cst_15 = arith.constant 0.000000e+00 : f32
    %19 = vector.broadcast %cst_15 : f32 to vector<8x256xf32>
    %20 = arith.maximumf %18, %19 : vector<8x256xf32>
    %21 = arith.truncf %20 : vector<8x256xf32> to vector<8x256xbf16>
    %c0_16 = arith.constant 0 : index
    %c0_17 = arith.constant 0 : index
    %c0_18 = arith.constant 0 : index
    %22 = vector.load %arg6[%c0_16, %c0_17, %c0_18] : memref<1x256x128xbf16, #tpu.memory_space<vmem>>, vector<1x256x128xbf16>
    %23 = vector.shape_cast %22 : vector<1x256x128xbf16> to vector<256x128xbf16>
    %cst_19 = arith.constant dense<0.000000e+00> : vector<8x128xf32>
    %24 = tpu.matmul %21, %23, %cst_19 {dimension_numbers = #tpu.dot_dimension_numbers<[1], [0], [0], [1], [0, 0, 1, 1], [], []>} : vector<8x256xbf16>, vector<256x128xbf16>, vector<8x128xf32> -> vector<8x128xf32>
    %c0_20 = arith.constant 0 : index
    %c0_21 = arith.constant 0 : index
    %c0_22 = arith.constant 0 : index
    %25 = vector.load %arg7[%c0_20, %c0_21, %c0_22] : memref<1x1x128xf32, #tpu.memory_space<vmem>>, vector<1x1x128xf32>
    %26 = vector.shape_cast %25 : vector<1x1x128xf32> to vector<1x128xf32>
    %27 = vector.broadcast %26 : vector<1x128xf32> to vector<8x128xf32>
    %28 = arith.addf %24, %27 : vector<8x128xf32>
    %c0_23 = arith.constant 0 : index
    %c0_24 = arith.constant 0 : index
    %c0_25 = arith.constant 0 : index
    %29 = vector.load %arg8[%c0_23, %c0_24, %c0_25] : memref<1x8x128xf32, #tpu.memory_space<vmem>>, vector<1x8x128xf32>
    %30 = vector.shape_cast %29 : vector<1x8x128xf32> to vector<8x128xf32>
    %31 = vector.shape_cast %28 : vector<8x128xf32> to vector<1x8x128xf32>
    tpu.vector_store %arg8[%c0_23, %c0_24, %c0_25], %31 {strides = array<i32>} : memref<1x8x128xf32, #tpu.memory_space<vmem>>, vector<1x8x128xf32>,
    return
  }
  func.func @transform_0(%arg0: i32) -> (i32, i32) {
    %c0_i32 = arith.constant 0 : i32
    %c0_i32_0 = arith.constant 0 : i32
    %c0_i32_1 = arith.constant 0 : i32
    return %c0_i32, %c0_i32_0 : i32, i32
  }
  func.func @transform_1(%arg0: i32) -> (i32, i32, i32) {
    %c0_i32 = arith.constant 0 : i32
    %c0_i32_0 = arith.constant 0 : i32
    %c0_i32_1 = arith.constant 0 : i32
    return %arg0, %c0_i32, %c0_i32_0 : i32, i32, i32
  }
  func.func @transform_2(%arg0: i32) -> (i32, i32, i32) {
    %c0_i32 = arith.constant 0 : i32
    %c0_i32_0 = arith.constant 0 : i32
    %c0_i32_1 = arith.constant 0 : i32
    return %arg0, %c0_i32, %c0_i32_0 : i32, i32, i32
  }
  func.func @transform_3(%arg0: i32) -> (i32, i32, i32) {
    %c0_i32 = arith.constant 0 : i32
    %c0_i32_0 = arith.constant 0 : i32
    %c0_i32_1 = arith.constant 0 : i32
    return %arg0, %c0_i32, %c0_i32_0 : i32, i32, i32
  }
  func.func @transform_4(%arg0: i32) -> (i32, i32, i32) {
    %c0_i32 = arith.constant 0 : i32
    %c0_i32_0 = arith.constant 0 : i32
    %c0_i32_1 = arith.constant 0 : i32
    return %arg0, %c0_i32, %c0_i32_0 : i32, i32, i32
  }
  func.func @transform_5(%arg0: i32) -> (i32, i32, i32) {
    %c0_i32 = arith.constant 0 : i32
    %c0_i32_0 = arith.constant 0 : i32
    %c0_i32_1 = arith.constant 0 : i32
    return %arg0, %c0_i32, %c0_i32_0 : i32, i32, i32
  }
  func.func @transform_6(%arg0: i32) -> (i32, i32, i32) {
    %c0_i32 = arith.constant 0 : i32
    %c0_i32_0 = arith.constant 0 : i32
    %c0_i32_1 = arith.constant 0 : i32
    return %arg0, %c0_i32, %c0_i32_0 : i32, i32, i32
  }
  func.func @transform_7(%arg0: i32) -> (i32, i32, i32) {
    %c0_i32 = arith.constant 0 : i32
    %c0_i32_0 = arith.constant 0 : i32
    %c0_i32_1 = arith.constant 0 : i32
    return %arg0, %c0_i32, %c0_i32_0 : i32, i32, i32
  }
}

</mosaic_0001>

<bundles_post_ra>
// kernel: deep_q_network_forward.1
= control target key start
LH: loop header
LB: loop body
LE: loop exit
PB: predicated region body
PF: predicated region fallthrough
CT: control target
= control target key end

     0   :  { %s1195_s24 = smov 0   ;;  %s1293_s0 = inlined_call_operand.vmem [shape: f32[8,8], index: 0, kind: input, shape index: {}]   ;;  %s1294_s1 = inlined_call_operand.vmem [shape: bf16[2,8,256], index: 1, kind: input, shape index: {}]   ;;  %s1295_s2 = inlined_call_operand.vmem [shape: f32[2,1,256], index: 2, kind: input, shape index: {}]   ;;  %s1296_s3 = inlined_call_operand.vmem [shape: bf16[2,256,256], index: 3, kind: input, shape index: {}]   ;;  %s1297_s4 = inlined_call_operand.vmem [shape: f32[2,1,256], index: 4, kind: input, shape index: {}]   ;;  %s1298_s5 = inlined_call_operand.vmem [shape: bf16[2,256,128], index: 5, kind: input, shape index: {}]   ;;  %s1299_s6 = inlined_call_operand.vmem [shape: f32[2,1,128], index: 6, kind: input, shape index: {}]   ;;  %s1300_s7 = inlined_call_operand.vmem [shape: f32[2,8,128], index: 7, kind: output, shape index: {}]  }
   0x1 LB: > { %s977_s25 = sadd.s32 4294967295, %s1152_s24   ;;  %p981_p0 = scmp.ge.s32.totalorder %s1152_s24, 1  ;;  %s1152_s24 = sphi %s1195_s24, %s17_s24  }
   0x2   : > { %p283_p1 = scmp.lt.s32.totalorder %s1152_s24, 3 }
   0x4   : > { %p284_p2 = pnand %p981_p0, %p283_p1 }
   0x5   : > { %p335_p3 = scmp.lt.s32.totalorder (!%p284_p2), %s977_s25, 1  ;;  %v1154_v0 = vmov (!%p284_p2), 0   ;;  %v366_v1 = vld [vmem:[%s1293_s0] sm:$0xff] (!%p284_p2)  ;;  %vm390_vm0 = vcmask (!%p284_p2), 1043456   ;;  %vm386_vm1 = vcmask (!%p284_p2), 64512   ;;  %v371_v51 = vlaneseq (!%p284_p2) }
   0x6   : > { %287 = sbr.rel (%p284_p2) target bundleno = 681 (0x2a9), region = 48  ;;  %429 = vmatprep.mubr.bf16.mxu0 (!%p284_p2), %v1154_v0  ;;  %v367_v9 = vpack.c.bf16 (!%p284_p2), %v366_v1, %v366_v1 }
   0x7   : > { %v372_v52 = vshrl.u32 (!%p284_p2), %v371_v51, 7 }
   0x9   : > { %v373_v53 = vsub.s32 (!%p284_p2), 0, %v372_v52  ;;  %v377_v55 = vsub.s32 (!%p284_p2), 1, %v372_v52 }
   0xd   : > { %s1302_s25 = smov (!%p335_p3, %s977_s25), 1 }
   0xe   : > { %s1046_s26 = sshll.u32 %s1302_s25, 3  ;;  %s1047_s27 = sshll.u32 %s1302_s25, 8 }
   0xf   : > { %s339_s30 = scalar_lea.vmem %s1294_s1, %s1046_s26  ;;  %s1215_s10 = scalar_lea.vmem %s1296_s3, %s1047_s27 }
  0x10   : > { %v368_v2 = vld [vmem:[%s339_s30] sm:$0xff]  ;;  %v1085_v7 = vld [vmem:[%s1215_s10 + $0x14] ss:$8 sps:$4 sm:$0xff]   ;;  %v1087_v10 = vld [vmem:[%s1215_s10 + $0x10] ss:$8 sps:$4 sm:$0xff]   ;;  %s1048_s13 = sshll.u32 %s1302_s25, 7  ;;  %s360_s29 = scalar_lea.vmem %s1299_s6, %s1302_s25 }
  0x11   : > { %v992_v3 = vcombine.high %v368_v2, %v368_v2  ;;  %v991_v4 = vcombine.low %v368_v2, %v368_v2  ;;  %v1082_v5 = vld [vmem:[%s1215_s10 + $0x4] ss:$8 sps:$4 sm:$0xff]   ;;  %v1084_v6 = vld [vmem:[%s1215_s10] ss:$8 sps:$4 sm:$0xff]   ;;  %v1091_v13 = vld [vmem:[%s1215_s10 + $0x34] ss:$8 sps:$4 sm:$0xff]   ;;  %s1236_s16 = scalar_lea.vmem %s1298_s5, %s1048_s13  ;;  %s364_s9 = scalar_lea.vmem %s1300_s7, %s1046_s26 }
  0x12   : > { %646 = vmatprep.subr.bf16.mxu1 %v1082_v5  ;;  %v1088_v11 = vld [vmem:[%s1215_s10 + $0x24] ss:$8 sps:$4 sm:$0xff]   ;;  %v1090_v12 = vld [vmem:[%s1215_s10 + $0x20] ss:$8 sps:$4 sm:$0xff]   ;;  %v1093_v14 = vld [vmem:[%s1215_s10 + $0x30] ss:$8 sps:$4 sm:$0xff]  }
  0x13   : > { %993 = vmatprep.subr.msk.bf16.mxu0 %vm390_vm0, %v992_v3  ;;  %v392_v8 = vsel %vm390_vm0, %v991_v4, 0  ;;  %647 = vmatpush1.bf16.msra.mxu1 %v1084_v6  ;;  %v1094_v15 = vld [vmem:[%s1215_s10 + $0x44] ss:$8 sps:$4 sm:$0xff]   ;;  %v1096_v16 = vld [vmem:[%s1215_s10 + $0x40] ss:$8 sps:$4 sm:$0xff]   ;;  %v1134_v43 = vld [vmem:[%s1236_s16 + $0x50] sm:$0xff]  }
  0x14   : > { %398 = vmatpush1.bf16.msra.mxu0 %v392_v8  ;;  %648 = vmatprep.subr.bf16.mxu1 %v1085_v7  ;;  %v1097_v17 = vld [vmem:[%s1215_s10 + $0x54] ss:$8 sps:$4 sm:$0xff]   ;;  %v1099_v18 = vld [vmem:[%s1215_s10 + $0x50] ss:$8 sps:$4 sm:$0xff]   ;;  %v1100_v19 = vld [vmem:[%s1215_s10 + $0x64] ss:$8 sps:$4 sm:$0xff]  }
  0x15   : > { %v1102_v20 = vld [vmem:[%s1215_s10 + $0x60] ss:$8 sps:$4 sm:$0xff]   ;;  %v1103_v21 = vld [vmem:[%s1215_s10 + $0x74] ss:$8 sps:$4 sm:$0xff]   ;;  %v1105_v22 = vld [vmem:[%s1215_s10 + $0x70] ss:$8 sps:$4 sm:$0xff]  }
  0x16   : > { %v1106_v23 = vld [vmem:[%s1215_s10 + $0x84] ss:$8 sps:$4 sm:$0xff]   ;;  %v1108_v24 = vld [vmem:[%s1215_s10 + $0x80] ss:$8 sps:$4 sm:$0xff]   ;;  %v1109_v25 = vld [vmem:[%s1215_s10 + $0x94] ss:$8 sps:$4 sm:$0xff]  }
  0x17   : > { %994 = vmatmul.mubr.msk.bf16.vlgmr.msra.gmra.mrb[0].mxu0 %vm386_vm1, %v367_v9  ;;  %649 = vmatpush1.bf16.msra.mxu1 %v1087_v10  ;;  %v1111_v26 = vld [vmem:[%s1215_s10 + $0x90] ss:$8 sps:$4 sm:$0xff]   ;;  %v1112_v27 = vld [vmem:[%s1215_s10 + $0xa4] ss:$8 sps:$4 sm:$0xff]   ;;  %v1114_v28 = vld [vmem:[%s1215_s10 + $0xa0] ss:$8 sps:$4 sm:$0xff]  }
  0x18   : > { %650 = vmatprep.subr.bf16.mxu1 %v1088_v11  ;;  %v1115_v29 = vld [vmem:[%s1215_s10 + $0xb4] ss:$8 sps:$4 sm:$0xff]   ;;  %v1117_v30 = vld [vmem:[%s1215_s10 + $0xb0] ss:$8 sps:$4 sm:$0xff]   ;;  %v1118_v31 = vld [vmem:[%s1215_s10 + $0xc4] ss:$8 sps:$4 sm:$0xff]  }
  0x19   : > { %v1120_v32 = vld [vmem:[%s1215_s10 + $0xc0] ss:$8 sps:$4 sm:$0xff]   ;;  %v1121_v33 = vld [vmem:[%s1215_s10 + $0xd4] ss:$8 sps:$4 sm:$0xff]   ;;  %v1123_v34 = vld [vmem:[%s1215_s10 + $0xd0] ss:$8 sps:$4 sm:$0xff]  }
  0x1a   : > { %v1124_v35 = vld [vmem:[%s1215_s10 + $0xe4] ss:$8 sps:$4 sm:$0xff]   ;;  %v1126_v36 = vld [vmem:[%s1215_s10 + $0xe0] ss:$8 sps:$4 sm:$0xff]   ;;  %v1127_v37 = vld [vmem:[%s1215_s10 + $0xf4] ss:$8 sps:$4 sm:$0xff]  }
  0x1b   : > { %651 = vmatpush1.bf16.msra.mxu1 %v1090_v12  ;;  %v1129_v38 = vld [vmem:[%s1215_s10 + $0xf0] ss:$8 sps:$4 sm:$0xff]   ;;  %v1130_v39 = vld [vmem:[%s1236_s16 + $0x40] sm:$0xff]   ;;  %v1132_v41 = vld [vmem:[%s1236_s16 + $0x48] sm:$0xff]   ;;  %s984_s17 = sshll.u32 %s1302_s25, 1 }
  0x1c   : > { %652 = vmatprep.subr.bf16.mxu1 %v1091_v13  ;;  %v1131_v40 = vld [vmem:[%s1236_s16] sm:$0xff]   ;;  %1049 = vmatprep.subr.bf16.mxu0 %v1130_v39  ;;  %v1133_v42 = vld [vmem:[%s1236_s16 + $0x8] sm:$0xff]   ;;  %v1135_v44 = vld [vmem:[%s1236_s16 + $0x10] sm:$0xff]   ;;  %s343_s20 = scalar_lea.vmem %s1295_s2, %s984_s17  ;;  %s352_s23 = scalar_lea.vmem %s1297_s4, %s984_s17 }
  0x1d   : > { %1050 = vmatpush3.bf16.msra.mxu0 %v1131_v40  ;;  %v1136_v45 = vld [vmem:[%s1236_s16 + $0x58] sm:$0xff]   ;;  %v1138_v47 = vld [vmem:[%s1236_s16 + $0x60] sm:$0xff]   ;;  %v1140_v49 = vld [vmem:[%s1236_s16 + $0x68] sm:$0xff]  }
  0x1e   : > { %1051 = vmatprep.subr.bf16.mxu0 %v1132_v41  ;;  %v1137_v46 = vld [vmem:[%s1236_s16 + $0x18] sm:$0xff]   ;;  %v1139_v48 = vld [vmem:[%s1236_s16 + $0x20] sm:$0xff]   ;;  %v1141_v50 = vld [vmem:[%s1236_s16 + $0x28] sm:$0xff]  }
  0x1f   : > { %653 = vmatpush1.bf16.msra.mxu1 %v1093_v14  ;;  %v369_v54 = vld [vmem:[%s343_s20] sm:$0x3]  ;;  %v1142_v4 = vld [vmem:[%s1236_s16 + $0x70] sm:$0xff]   ;;  %v1144_v6 = vld [vmem:[%s1236_s16 + $0x78] sm:$0xff]  }
  0x20   : > { %654 = vmatprep.subr.bf16.mxu1 %v1094_v15  ;;  %v374_v56 = vrot.slane %v369_v54, %v373_v53  ;;  %v378_v57 = vrot.slane %v369_v54, %v377_v55  ;;  %v1143_v5 = vld [vmem:[%s1236_s16 + $0x30] sm:$0xff]   ;;  %v1145_v7 = vld [vmem:[%s1236_s16 + $0x38] sm:$0xff]   ;;  %v474_v8 = vld [vmem:[%s352_s23] sm:$0x3] }
  0x21   : > { %1052 = vmatpush3.bf16.msra.mxu0 %v1133_v42  ;;  %v479_v9 = vrot.slane %v474_v8, %v373_v53  ;;  %v483_v10 = vrot.slane %v474_v8, %v377_v55 }
  0x22   : > { %1053 = vmatprep.subr.bf16.mxu0 %v1134_v43 }
  0x23   : > { %655 = vmatpush1.bf16.msra.mxu1 %v1096_v16 }
  0x24   : > { %656 = vmatprep.subr.bf16.mxu1 %v1097_v17 }
  0x25   : > { %1054 = vmatpush3.bf16.msra.mxu0 %v1135_v44 }
  0x26   : > { %1055 = vmatprep.subr.bf16.mxu0 %v1136_v45 }
  0x27   : > { %657 = vmatpush1.bf16.msra.mxu1 %v1099_v18 }
  0x28   : > { %658 = vmatprep.subr.bf16.mxu1 %v1100_v19 }
  0x29   : > { %1056 = vmatpush3.bf16.msra.mxu0 %v1137_v46 }
  0x2a   : > { %1057 = vmatprep.subr.bf16.mxu0 %v1138_v47 }
  0x2b   : > { %659 = vmatpush1.bf16.msra.mxu1 %v1102_v20 }
  0x2c   : > { %660 = vmatprep.subr.bf16.mxu1 %v1103_v21 }
  0x2d   : > { %1058 = vmatpush3.bf16.msra.mxu0 %v1139_v48 }
  0x2e   : > { %1059 = vmatprep.subr.bf16.mxu0 %v1140_v49 }
  0x2f   : > { %661 = vmatpush1.bf16.msra.mxu1 %v1105_v22  ;;  %v1027_v22 = vld [vmem:[%s360_s29] ss:$0 sm:$0xff] }
  0x30   : > { %662 = vmatprep.subr.bf16.mxu1 %v1106_v23 }
  0x31   : > { %1060 = vmatpush3.bf16.msra.mxu0 %v1141_v50 }
  0x32   : > { %1061 = vmatprep.subr.bf16.mxu0 %v1142_v4 }
  0x33   : > { %663 = vmatpush1.bf16.msra.mxu1 %v1108_v24 }
  0x34   : > { %664 = vmatprep.subr.bf16.mxu1 %v1109_v25 }
  0x35   : > { %1062 = vmatpush3.bf16.msra.mxu0 %v1143_v5 }
  0x36   : > { %1063 = vmatprep.subr.bf16.mxu0 %v1144_v6 }
  0x37   : > { %665 = vmatpush1.bf16.msra.mxu1 %v1111_v26 }
  0x38   : > { %666 = vmatprep.subr.bf16.mxu1 %v1112_v27 }
  0x39   : > { %1064 = vmatpush3.bf16.msra.mxu0 %v1145_v7 }
  0x3b   : > { %667 = vmatpush1.bf16.msra.mxu1 %v1114_v28 }
  0x3c   : > { %668 = vmatprep.subr.bf16.mxu1 %v1115_v29 }
  0x3f   : > { %669 = vmatpush1.bf16.msra.mxu1 %v1117_v30 }
  0x40   : > { %670 = vmatprep.subr.bf16.mxu1 %v1118_v31 }
  0x43   : > { %671 = vmatpush1.bf16.msra.mxu1 %v1120_v32 }
  0x44   : > { %672 = vmatprep.subr.bf16.mxu1 %v1121_v33 }
  0x47   : > { %673 = vmatpush1.bf16.msra.mxu1 %v1123_v34 }
  0x48   : > { %674 = vmatprep.subr.bf16.mxu1 %v1124_v35 }
  0x4b   : > { %675 = vmatpush1.bf16.msra.mxu1 %v1126_v36 }
  0x4c   : > { %676 = vmatprep.subr.bf16.mxu1 %v1127_v37 }
  0x4f   : > { %677 = vmatpush1.bf16.msra.mxu1 %v1129_v38 }
  0xea   : > { %v431_v58 = vpop.f32.mrb[0].mxu0 }
  0xeb   : > { %v432_v59 = vadd.f32 %v431_v58, %v374_v56  ;;  %v433_v60 = vpop.f32.mrb[1].mxu0 }
  0xec   : > { %v434_v61 = vadd.f32 %v433_v60, %v378_v57  ;;  %v435_v62 = vpop.f32.mrb[2].mxu0 }
  0xed   : > { %v438_v63 = vmax.f32 %v432_v59, 0.0  ;;  %v436_v0 = vpop.f32.mrb[3].mxu0 }
  0xee   : > { %v439_v1 = vmax.f32 %v434_v61, 0.0 }
  0xef   : > { %v440_v3 = vpack.c.bf16 %v438_v63, %v438_v63 }
  0xf0   : > { %v441_v2 = vpack.c.bf16 %v439_v1, %v439_v1 }
  0xf2   : > { %678 = vmatprep.mubr.bf16.mxu1 %v441_v2 }
  0xf3   : > { %679 = vmatmul.mubr.bf16.vlgmr.msra.gmra.mrb[0].mxu1 %v440_v3 }
 0x1c6   : > { %v680_v11 = vpop.f32.mrb[0].mxu1 }
 0x1c7   : > { %v681_v12 = vadd.f32 %v680_v11, %v479_v9  ;;  %v682_v13 = vpop.f32.mrb[1].mxu1 }
 0x1c8   : > { %v683_v14 = vadd.f32 %v682_v13, %v483_v10  ;;  %v684_v15 = vpop.f32.mrb[2].mxu1 }
 0x1c9   : > { %v687_v16 = vmax.f32 %v681_v12, 0.0  ;;  %v685_v17 = vpop.f32.mrb[3].mxu1 }
 0x1ca   : > { %v688_v18 = vmax.f32 %v683_v14, 0.0 }
 0x1cb   : > { %v689_v20 = vpack.c.bf16 %v687_v16, %v687_v16 }
 0x1cc   : > { %v690_v19 = vpack.c.bf16 %v688_v18, %v688_v18 }
 0x1ce   : > { %858 = vmatprep.mubr.bf16.mxu0 %v690_v19 }
 0x1cf   : > { %859 = vmatmul.mubr.bf16.vlgmr.msra.gmra.mrb[4].mxu0 %v689_v20 }
 0x2a2   : > { %v1065_v21 = vpop.f32.mrb[4].mxu0 }
 0x2a3   : > { %v1066_v23 = vpop.f32.mrb[5].mxu0 }
 0x2a4   : > { %v1067_v24 = vadd.f32 %v1066_v23, %v1065_v21  ;;  %v1068_v25 = vpop.f32.mrb[6].mxu0 }
 0x2a5   : > { %v1069_v26 = vpop.f32.mrb[7].mxu0 }
 0x2a6   : > { %v861_v27 = vadd.f32 %v1067_v24, %v1027_v22 }
 0x2a8   : > { %866 = vst [vmem:[%s364_s9] sm:$0xff] %v861_v27 }
 0x2a9 PF: > { %s17_s24 = sadd.s32 1, %s1152_s24  }
 0x2aa   : > { %p14_p4 = scmp.ge.s32.totalorder %s17_s24, 4  }
 0x2ac   :  { %16 = sbr.rel (!%p14_p4) target bundleno = 1 (0x1), region = 93 }

</bundles_post_ra>
